<compile_context>
chip_gen: v7x
topology: tpu7x:2x2x1
jax: 0.10.0
libtpu: 0.0.40
codegen_flags: <defaults>
</compile_context>

<pallas_src>
import functools

import numpy as np

import jax
import jax.numpy as jnp
from jax.experimental import pallas as pl
from jax.experimental.pallas import tpu as pltpu

_BATCH_TILE = 1024   # rows per grid step when the batch is large (fits v5e/v7x easily)


# ------------------------------------------------------------------ kernel


def _softplus(x):
    # Numerically stable softplus.  jnp.log(1 + exp(-|x|)) (instead of log1p) is
    # used because it is guaranteed to lower on Mosaic; the difference vs log1p
    # is <~1e-7 for the logvar clamp range used here.
    return jnp.maximum(x, 0.0) + jnp.log(1.0 + jnp.exp(-jnp.abs(x)))


def _fused_forward_kernel(x_ref, w1c_ref, b1_ref, w2_ref, b2_ref, w3_ref, b3_ref,
                          wfc_ref, bfc_ref, wht_ref, bht_ref,
                          maxlv_ref, minlv_ref,
                          out_ref, *, adim, val_off, lv_off):
    # bf16 operands for every MXU pass, f32 accumulate, f32 elementwise.
    xb = x_ref[...].astype(jnp.bfloat16)                            # (Bt, 147)

    # --- conv1 (3->16, 2x2 valid) fused with MaxPool2d(2,2): max over the 4
    #     pooling corners of relu(x @ W1k + b1).  One matmul per corner.
    b1 = b1_ref[...]
    h = jnp.maximum(
        jnp.dot(xb, w1c_ref[0], preferred_element_type=jnp.float32) + b1, 0.0)
    for k in range(1, 4):
        hk = jnp.maximum(
            jnp.dot(xb, w1c_ref[k], preferred_element_type=jnp.float32) + b1, 0.0)
        h = jnp.maximum(h, hk)                                      # (Bt, 144) = (3,3,16)

    # --- conv2 (16->32, 2x2 valid) as a single dense matmul.
    h = jnp.maximum(
        jnp.dot(h.astype(jnp.bfloat16), w2_ref[...],
                preferred_element_type=jnp.float32) + b2_ref[...], 0.0)   # (Bt, 128)

    # --- conv3 (32->64, 2x2 valid).
    h = jnp.maximum(
        jnp.dot(h.astype(jnp.bfloat16), w3_ref[...],
                preferred_element_type=jnp.float32) + b3_ref[...], 0.0)   # (Bt, 64) == Flatten

    # --- FC 64 -> hidden, ReLU.
    feat = jnp.maximum(
        jnp.dot(h.astype(jnp.bfloat16), wfc_ref[...],
                preferred_element_type=jnp.float32) + bfc_ref[...], 0.0)  # (Bt, hidden)

    # --- Head, computed TRANSPOSED (rows = head outputs, lanes = batch):
    #     z_T[n, b] = sum_h Wt[n, h] * feat[b, h]   (A @ B^T on the MXU)
    zT = jax.lax.dot_general(
        wht_ref[...], feat.astype(jnp.bfloat16),
        dimension_numbers=(((1,), (1,)), ((), ())),
        preferred_element_type=jnp.float32) + bht_ref[...]           # (24, Bt)

    adv = zT[0:adim, :]                                              # (A, Bt)
    val = zT[val_off:val_off + 1, :]                                 # (1, Bt)
    lv = zT[lv_off:lv_off + adim, :]                                 # (A, Bt)

    max_lv = maxlv_ref[0, 0]
    min_lv = minlv_ref[0, 0]
    lv = max_lv - _softplus(max_lv - lv)
    lv = min_lv + _softplus(lv - min_lv)

    # Merged lane-dense output: rows [0:A] = q, rows [A:2A] = logvar.
    out_ref[0:adim, :] = val + adv - jnp.mean(adv, axis=0, keepdims=True)
    out_ref[adim:2 * adim, :] = lv


# --------------------------------------------------- parameter preparation


def _conv_as_matrix(w, H, W):
    """Dense matrix of a 'valid' 2-D cross-correlation on an NHWC-flattened vector.

    w: PyTorch layout (Cout, Cin, KH, KW).  Returns (H*W*Cin, Ho*Wo*Cout) with
    row index  y*W*Cin + x*Cin + ci  and column index  (yo*Wo + xo)*Cout + co.
    """
    w = np.asarray(w, np.float32)
    Cout, Cin, KH, KW = w.shape
    Ho, Wo = H - KH + 1, W - KW + 1
    M = np.zeros((H, W, Cin, Ho, Wo, Cout), np.float32)
    for yo in range(Ho):
        for xo in range(Wo):
            for dy in range(KH):
                for dx in range(KW):
                    M[yo + dy, xo + dx, :, yo, xo, :] = w[:, :, dy, dx].T
    return M.reshape(H * W * Cin, Ho * Wo * Cout)


def prepare_params(p, input_hw=(7, 7)):
    """Fold convolutions / pooling / head concat into kernel-ready constants (once)."""
    H, W = input_hw
    w1 = np.asarray(p['w1'], np.float32)
    c1out, c1in = w1.shape[0], w1.shape[1]
    Ho, Wo = H - 1, W - 1
    Hp, Wp = Ho // 2, Wo // 2
    assert (Hp - 2) * (Wp - 2) == 1, "spatial size must flatten to exactly 64 features"

    # conv1 fused with the 2x2/stride-2 maxpool: one matrix per pooling corner.
    M1 = _conv_as_matrix(w1, H, W).reshape(H * W * c1in, Ho, Wo, c1out)
    w1c = np.stack(
        [M1[:, dy:2 * Hp:2, dx:2 * Wp:2, :].reshape(H * W * c1in, Hp * Wp * c1out)
         for dy in range(2) for dx in range(2)], axis=0)                 # (4, 147, 144)
    b1c = np.tile(np.asarray(p['b1'], np.float32), Hp * Wp)[None, :]     # (1, 144)

    # conv2: (3,3,16) -> (2,2,32), conv3: (2,2,32) -> (1,1,64).
    M2 = _conv_as_matrix(p['w2'], Hp, Wp)                                # (144, 128)
    b2c = np.tile(np.asarray(p['b2'], np.float32), (Hp - 1) * (Wp - 1))[None, :]
    M3 = _conv_as_matrix(p['w3'], Hp - 1, Wp - 1)                        # (128, 64)
    b3c = np.asarray(p['b3'], np.float32)[None, :]

    # Transposed head: rows 0..A-1 = adv, row val_off = value, rows lv_off.. = logvar.
    # Chunks sit at sublane-group (8-row) boundaries so in-kernel slices are aligned.
    hidden = int(np.asarray(p['w_fc']).shape[1])
    A = int(np.asarray(p['w_adv']).shape[1])
    val_off = ((A + 7) // 8) * 8
    lv_off = val_off + 8
    rows = lv_off + ((A + 7) // 8) * 8
    wht = np.zeros((rows, hidden), np.float32)
    bht = np.zeros((rows, 1), np.float32)
    wht[0:A] = np.asarray(p['w_adv'], np.float32).T
    bht[0:A, 0] = np.asarray(p['b_adv'], np.float32)
    wht[val_off] = np.asarray(p['w_val'], np.float32)[:, 0]
    bht[val_off, 0] = np.asarray(p['b_val'], np.float32)[0]
    wht[lv_off:lv_off + A] = np.asarray(p['w_lv'], np.float32).T
    bht[lv_off:lv_off + A, 0] = np.asarray(p['b_lv'], np.float32)

    return dict(
        adim=A, val_off=int(val_off), lv_off=int(lv_off),
        # matmul operands stored bf16; biases / clamp scalars stay f32.
        w1c=jnp.asarray(w1c, jnp.bfloat16), b1=jnp.asarray(b1c, jnp.float32),
        w2=jnp.asarray(M2, jnp.bfloat16), b2=jnp.asarray(b2c, jnp.float32),
        w3=jnp.asarray(M3, jnp.bfloat16), b3=jnp.asarray(b3c, jnp.float32),
        w_fc=jnp.asarray(p['w_fc'], jnp.bfloat16),
        b_fc=jnp.asarray(p['b_fc'], jnp.float32).reshape(1, -1),
        w_head_t=jnp.asarray(wht, jnp.bfloat16),
        b_head_t=jnp.asarray(bht, jnp.float32),
        max_logvar=jnp.asarray(p['max_logvar'], jnp.float32).reshape(1, 1),
        min_logvar=jnp.asarray(p['min_logvar'], jnp.float32).reshape(1, 1),
    )


# ------------------------------------------------------------------ wrapper


def forward(kp, x):
    """Fused GaussianNoiseCNNNetwork.forward (bn=False, p=0.0, big_head=False, task 0).

    x: (B, H, W, 3) float NHWC (the tensor PyTorch's forward receives before its
    internal transpose to NCHW).  Returns (q_vals, logvar), each (B, output_dim).
    """
    B = x.shape[0]
    d_in = kp['w1c'].shape[1]
    adim = kp['adim']
    x2d = x.reshape(B, d_in)        # no dtype cast here (kernel casts to bf16 itself)

    if B <= 256:
        bt = B                      # single block: block dims == full array dims
    else:
        # >= 2 grid steps (keeps both v7x TensorCores busy) and 128-aligned lane
        # tiling for the transposed (2*adim, B) output.  No padding copy of x:
        # the ragged last block is handled by Pallas (row-wise math only).
        bt = min(_BATCH_TILE, ((pl.cdiv(B, 2) + 127) // 128) * 128)
    grid = (pl.cdiv(B, bt),)

    def _rep(arr):                  # weight resident in VMEM, constant block index
        nd = arr.ndim
        return pl.BlockSpec(arr.shape, lambda i: (0,) * nd)

    in_specs = [
        pl.BlockSpec((bt, d_in), lambda i: (i, 0)),                  # x (batch-tiled)
        _rep(kp['w1c']), _rep(kp['b1']),
        _rep(kp['w2']), _rep(kp['b2']),
        _rep(kp['w3']), _rep(kp['b3']),
        _rep(kp['w_fc']), _rep(kp['b_fc']),
        _rep(kp['w_head_t']), _rep(kp['b_head_t']),
        pl.BlockSpec((1, 1), lambda i: (0, 0), memory_space=pltpu.MemorySpace.SMEM),
        pl.BlockSpec((1, 1), lambda i: (0, 0), memory_space=pltpu.MemorySpace.SMEM),
    ]
    # Single merged, lane-dense (batch-in-lanes) output: rows [0:A]=q, [A:2A]=logvar.
    out_specs = pl.BlockSpec((2 * adim, bt), lambda i: (0, i))

    out = pl.pallas_call(
        functools.partial(_fused_forward_kernel, adim=adim,
                          val_off=kp['val_off'], lv_off=kp['lv_off']),
        grid=grid,
        in_specs=in_specs,
        out_specs=out_specs,
        out_shape=jax.ShapeDtypeStruct((2 * adim, B), jnp.float32),
        compiler_params=pltpu.CompilerParams(
            dimension_semantics=("parallel",),
            vmem_limit_bytes=48 * 1024 * 1024),
    )(x2d, kp['w1c'], kp['b1'], kp['w2'], kp['b2'], kp['w3'], kp['b3'],
      kp['w_fc'], kp['b_fc'], kp['w_head_t'], kp['b_head_t'],
      kp['max_logvar'], kp['min_logvar'])

    q = out[:adim, :].T
    lv = out[adim:, :].T
    return q, lv


# ------------------------------------------------------- params & reference


def make_params(key, hidden_size=64, output_dim=4):
    ks = jax.random.split(key, 14)

    def w(k, shape, fan_in):
        return (jax.random.normal(k, shape, jnp.float32) / jnp.sqrt(fan_in)).astype(jnp.float32)

    return dict(
        w1=w(ks[0], (16, 3, 2, 2), 3 * 4), b1=w(ks[1], (16,), 16),
        w2=w(ks[2], (32, 16, 2, 2), 16 * 4), b2=w(ks[3], (32,), 32),
        w3=w(ks[4], (64, 32, 2, 2), 32 * 4), b3=w(ks[5], (64,), 64),
        w_fc=w(ks[6], (64, hidden_size), 64), b_fc=w(ks[7], (hidden_size,), 64),
        w_adv=w(ks[8], (hidden_size, output_dim), hidden_size),
        b_adv=w(ks[9], (output_dim,), hidden_size),
        w_val=w(ks[10], (hidden_size, 1), hidden_size),
        b_val=w(ks[11], (1,), hidden_size),
        w_lv=w(ks[12], (hidden_size, output_dim), hidden_size),
        b_lv=w(ks[13], (output_dim,), hidden_size),
        max_logvar=jnp.array([0.0], jnp.float32),    # nn.Parameter init 0.0
        min_logvar=jnp.array([-10.0], jnp.float32),  # nn.Parameter init -10.0
    )


def forward_ref(params, x):
    """Pure-jnp f32 reference (same math as the PyTorch module) for a correctness check."""
    def conv_ref(x, w, b):
        B, H, W, Cin = x.shape
        Cout = w.shape[0]
        Ho, Wo = H - 1, W - 1
        patches = jnp.stack(
            [x[:, kh:kh + Ho, kw:kw + Wo, :] for kh in range(2) for kw in range(2)],
            axis=3).reshape(B * Ho * Wo, 4 * Cin)
        wm = jnp.transpose(w, (2, 3, 1, 0)).reshape(4 * Cin, Cout)
        return jnp.maximum(patches @ wm + b, 0.0).reshape(B, Ho, Wo, Cout)

    h = conv_ref(x, params['w1'], params['b1'])
    B, H, W, C = h.shape
    h = h.reshape(B, H // 2, 2, W // 2, 2, C).max(axis=(2, 4))
    h = conv_ref(h, params['w2'], params['b2'])
    h = conv_ref(h, params['w3'], params['b3'])
    h = h.reshape(B, -1)
    feat = jnp.maximum(h @ params['w_fc'] + params['b_fc'], 0.0)
    adv = feat @ params['w_adv'] + params['b_adv']
    val = feat @ params['w_val'] + params['b_val']
    lv = feat @ params['w_lv'] + params['b_lv']
    mx, mn = params['max_logvar'][0], params['min_logvar'][0]
    sp = lambda t: jnp.maximum(t, 0.0) + jnp.log1p(jnp.exp(-jnp.abs(t)))
    lv = mx - sp(mx - lv)
    lv = mn + sp(lv - mn)
    q = val + adv - adv.mean(axis=1, keepdims=True)
    return q, lv


if __name__ == "__main__":
    key = jax.random.PRNGKey(0)
    kx, kp_key, kx2 = jax.random.split(key, 3)
    params = make_params(kp_key, hidden_size=64, output_dim=4)
    kparams = prepare_params(params, input_hw=(7, 7))   # offline constant folding

    # bf16 matmuls (f32 accumulate) -> compare against the f32 reference with a
    # correspondingly relaxed tolerance.
    TOL = dict(atol=5e-2, rtol=5e-2)

    # --- small batch (single grid step): input as given to PyTorch forward,
    #     (B, H, W, 3) with H=W=7 so Flatten -> 64.
    x = jax.random.normal(kx, (2, 7, 7, 3), jnp.float32)
    q, logvar = forward(kparams, x)
    jax.block_until_ready((q, logvar))
    q_ref, lv_ref = forward_ref(params, x)
    assert q.shape == (2, 4) and logvar.shape == (2, 4)
    assert jnp.allclose(q, q_ref, **TOL)
    assert jnp.allclose(logvar, lv_ref, **TOL)

    # --- larger batch: exercises the multi-step grid, the two-TensorCore split
    #     and the ragged (unpadded) last block.
    xb = jax.random.normal(kx2, (300, 7, 7, 3), jnp.float32)
    qb, lvb = forward(kparams, xb)
    jax.block_until_ready((qb, lvb))
    qb_ref, lvb_ref = forward_ref(params, xb)
    assert qb.shape == (300, 4) and lvb.shape == (300, 4)
    assert jnp.allclose(qb, qb_ref, **TOL)
    assert jnp.allclose(lvb, lvb_ref, **TOL)

    print("KERNEL_OK")
</pallas_src>

<mosaic_0001>
module attributes {stable_mosaic.version = 11 : i64} {
  func.func @_fused_forward_kernel(%arg0: i32, %arg1: memref<2x147xf32, #tpu.memory_space<vmem>>, %arg2: memref<4x147x144xbf16, #tpu.memory_space<vmem>>, %arg3: memref<1x144xf32, #tpu.memory_space<vmem>>, %arg4: memref<144x128xbf16, #tpu.memory_space<vmem>>, %arg5: memref<1x128xf32, #tpu.memory_space<vmem>>, %arg6: memref<128x64xbf16, #tpu.memory_space<vmem>>, %arg7: memref<1x64xf32, #tpu.memory_space<vmem>>, %arg8: memref<64x64xbf16, #tpu.memory_space<vmem>>, %arg9: memref<1x64xf32, #tpu.memory_space<vmem>>, %arg10: memref<24x64xbf16, #tpu.memory_space<vmem>>, %arg11: memref<24x1xf32, #tpu.memory_space<vmem>>, %arg12: memref<1x1xf32, #tpu.memory_space<smem>>, %arg13: memref<1x1xf32, #tpu.memory_space<smem>>, %arg14: memref<8x2xf32, #tpu.memory_space<vmem>>) attributes {dimension_semantics = [#tpu.dimension_semantics<parallel>], iteration_bounds = array<i64: 1>, scalar_prefetch = 0 : i64, scratch_operands = 0 : i64, tpu.core_type = #tpu.core_type<tc>, window_params = [{transform_indices = @transform_0, window_bounds = array<i64: 2, 147>}, {pipeline_mode = #tpu.pipeline_mode<synchronous>, transform_indices = @transform_1, window_bounds = array<i64: 4, 147, 144>}, {pipeline_mode = #tpu.pipeline_mode<synchronous>, transform_indices = @transform_2, window_bounds = array<i64: 1, 144>}, {pipeline_mode = #tpu.pipeline_mode<synchronous>, transform_indices = @transform_3, window_bounds = array<i64: 144, 128>}, {pipeline_mode = #tpu.pipeline_mode<synchronous>, transform_indices = @transform_4, window_bounds = array<i64: 1, 128>}, {pipeline_mode = #tpu.pipeline_mode<synchronous>, transform_indices = @transform_5, window_bounds = array<i64: 128, 64>}, {pipeline_mode = #tpu.pipeline_mode<synchronous>, transform_indices = @transform_6, window_bounds = array<i64: 1, 64>}, {pipeline_mode = #tpu.pipeline_mode<synchronous>, transform_indices = @transform_7, window_bounds = array<i64: 64, 64>}, {pipeline_mode = #tpu.pipeline_mode<synchronous>, transform_indices = @transform_8, window_bounds = array<i64: 1, 64>}, {pipeline_mode = #tpu.pipeline_mode<synchronous>, transform_indices = @transform_9, window_bounds = array<i64: 24, 64>}, {pipeline_mode = #tpu.pipeline_mode<synchronous>, transform_indices = @transform_10, window_bounds = array<i64: 24, 1>}, {transform_indices = @transform_11, window_bounds = array<i64: 1, 1>}, {transform_indices = @transform_12, window_bounds = array<i64: 1, 1>}, {transform_indices = @transform_13, window_bounds = array<i64: 8, 2>}]} {
    %c0 = arith.constant 0 : index
    %c0_0 = arith.constant 0 : index
    %0 = vector.load %arg1[%c0, %c0_0] : memref<2x147xf32, #tpu.memory_space<vmem>>, vector<2x147xf32>
    %1 = arith.truncf %0 : vector<2x147xf32> to vector<2x147xbf16>
    %c0_1 = arith.constant 0 : index
    %c0_2 = arith.constant 0 : index
    %2 = vector.load %arg3[%c0_1, %c0_2] : memref<1x144xf32, #tpu.memory_space<vmem>>, vector<1x144xf32>
    %c0_3 = arith.constant 0 : index
    %c0_4 = arith.constant 0 : index
    %c0_5 = arith.constant 0 : index
    %3 = vector.load %arg2[%c0_3, %c0_4, %c0_5] : memref<4x147x144xbf16, #tpu.memory_space<vmem>>, vector<1x147x144xbf16>
    %4 = vector.shape_cast %3 : vector<1x147x144xbf16> to vector<147x144xbf16>
    %cst = arith.constant dense<0.000000e+00> : vector<2x144xf32>
    %5 = tpu.matmul %1, %4, %cst {dimension_numbers = #tpu.dot_dimension_numbers<[1], [0], [0], [1], [0, 0, 1, 1], [], []>} : vector<2x147xbf16>, vector<147x144xbf16>, vector<2x144xf32> -> vector<2x144xf32>
    %6 = vector.broadcast %2 : vector<1x144xf32> to vector<2x144xf32>
    %7 = arith.addf %5, %6 : vector<2x144xf32>
    %cst_6 = arith.constant 0.000000e+00 : f32
    %8 = vector.broadcast %cst_6 : f32 to vector<2x144xf32>
    %9 = arith.maximumf %7, %8 : vector<2x144xf32>
    %c1 = arith.constant 1 : index
    %c0_7 = arith.constant 0 : index
    %c0_8 = arith.constant 0 : index
    %10 = vector.load %arg2[%c1, %c0_7, %c0_8] : memref<4x147x144xbf16, #tpu.memory_space<vmem>>, vector<1x147x144xbf16>
    %11 = vector.shape_cast %10 : vector<1x147x144xbf16> to vector<147x144xbf16>
    %cst_9 = arith.constant dense<0.000000e+00> : vector<2x144xf32>
    %12 = tpu.matmul %1, %11, %cst_9 {dimension_numbers = #tpu.dot_dimension_numbers<[1], [0], [0], [1], [0, 0, 1, 1], [], []>} : vector<2x147xbf16>, vector<147x144xbf16>, vector<2x144xf32> -> vector<2x144xf32>
    %13 = vector.broadcast %2 : vector<1x144xf32> to vector<2x144xf32>
    %14 = arith.addf %12, %13 : vector<2x144xf32>
    %cst_10 = arith.constant 0.000000e+00 : f32
    %15 = vector.broadcast %cst_10 : f32 to vector<2x144xf32>
    %16 = arith.maximumf %14, %15 : vector<2x144xf32>
    %17 = arith.maximumf %9, %16 : vector<2x144xf32>
    %c2 = arith.constant 2 : index
    %c0_11 = arith.constant 0 : index
    %c0_12 = arith.constant 0 : index
    %18 = vector.load %arg2[%c2, %c0_11, %c0_12] : memref<4x147x144xbf16, #tpu.memory_space<vmem>>, vector<1x147x144xbf16>
    %19 = vector.shape_cast %18 : vector<1x147x144xbf16> to vector<147x144xbf16>
    %cst_13 = arith.constant dense<0.000000e+00> : vector<2x144xf32>
    %20 = tpu.matmul %1, %19, %cst_13 {dimension_numbers = #tpu.dot_dimension_numbers<[1], [0], [0], [1], [0, 0, 1, 1], [], []>} : vector<2x147xbf16>, vector<147x144xbf16>, vector<2x144xf32> -> vector<2x144xf32>
    %21 = vector.broadcast %2 : vector<1x144xf32> to vector<2x144xf32>
    %22 = arith.addf %20, %21 : vector<2x144xf32>
    %cst_14 = arith.constant 0.000000e+00 : f32
    %23 = vector.broadcast %cst_14 : f32 to vector<2x144xf32>
    %24 = arith.maximumf %22, %23 : vector<2x144xf32>
    %25 = arith.maximumf %17, %24 : vector<2x144xf32>
    %c3 = arith.constant 3 : index
    %c0_15 = arith.constant 0 : index
    %c0_16 = arith.constant 0 : index
    %26 = vector.load %arg2[%c3, %c0_15, %c0_16] : memref<4x147x144xbf16, #tpu.memory_space<vmem>>, vector<1x147x144xbf16>
    %27 = vector.shape_cast %26 : vector<1x147x144xbf16> to vector<147x144xbf16>
    %cst_17 = arith.constant dense<0.000000e+00> : vector<2x144xf32>
    %28 = tpu.matmul %1, %27, %cst_17 {dimension_numbers = #tpu.dot_dimension_numbers<[1], [0], [0], [1], [0, 0, 1, 1], [], []>} : vector<2x147xbf16>, vector<147x144xbf16>, vector<2x144xf32> -> vector<2x144xf32>
    %29 = vector.broadcast %2 : vector<1x144xf32> to vector<2x144xf32>
    %30 = arith.addf %28, %29 : vector<2x144xf32>
    %cst_18 = arith.constant 0.000000e+00 : f32
    %31 = vector.broadcast %cst_18 : f32 to vector<2x144xf32>
    %32 = arith.maximumf %30, %31 : vector<2x144xf32>
    %33 = arith.maximumf %25, %32 : vector<2x144xf32>
    %34 = arith.truncf %33 : vector<2x144xf32> to vector<2x144xbf16>
    %c0_19 = arith.constant 0 : index
    %c0_20 = arith.constant 0 : index
    %35 = vector.load %arg4[%c0_19, %c0_20] : memref<144x128xbf16, #tpu.memory_space<vmem>>, vector<144x128xbf16>
    %cst_21 = arith.constant dense<0.000000e+00> : vector<2x128xf32>
    %36 = tpu.matmul %34, %35, %cst_21 {dimension_numbers = #tpu.dot_dimension_numbers<[1], [0], [0], [1], [0, 0, 1, 1], [], []>} : vector<2x144xbf16>, vector<144x128xbf16>, vector<2x128xf32> -> vector<2x128xf32>
    %c0_22 = arith.constant 0 : index
    %c0_23 = arith.constant 0 : index
    %37 = vector.load %arg5[%c0_22, %c0_23] : memref<1x128xf32, #tpu.memory_space<vmem>>, vector<1x128xf32>
    %38 = vector.broadcast %37 : vector<1x128xf32> to vector<2x128xf32>
    %39 = arith.addf %36, %38 : vector<2x128xf32>
    %cst_24 = arith.constant 0.000000e+00 : f32
    %40 = vector.broadcast %cst_24 : f32 to vector<2x128xf32>
    %41 = arith.maximumf %39, %40 : vector<2x128xf32>
    %42 = arith.truncf %41 : vector<2x128xf32> to vector<2x128xbf16>
    %c0_25 = arith.constant 0 : index
    %c0_26 = arith.constant 0 : index
    %43 = vector.load %arg6[%c0_25, %c0_26] : memref<128x64xbf16, #tpu.memory_space<vmem>>, vector<128x64xbf16>
    %cst_27 = arith.constant dense<0.000000e+00> : vector<2x64xf32>
    %44 = tpu.matmul %42, %43, %cst_27 {dimension_numbers = #tpu.dot_dimension_numbers<[1], [0], [0], [1], [0, 0, 1, 1], [], []>} : vector<2x128xbf16>, vector<128x64xbf16>, vector<2x64xf32> -> vector<2x64xf32>
    %c0_28 = arith.constant 0 : index
    %c0_29 = arith.constant 0 : index
    %45 = vector.load %arg7[%c0_28, %c0_29] : memref<1x64xf32, #tpu.memory_space<vmem>>, vector<1x64xf32>
    %46 = vector.broadcast %45 : vector<1x64xf32> to vector<2x64xf32>
    %47 = arith.addf %44, %46 : vector<2x64xf32>
    %cst_30 = arith.constant 0.000000e+00 : f32
    %48 = vector.broadcast %cst_30 : f32 to vector<2x64xf32>
    %49 = arith.maximumf %47, %48 : vector<2x64xf32>
    %50 = arith.truncf %49 : vector<2x64xf32> to vector<2x64xbf16>
    %c0_31 = arith.constant 0 : index
    %c0_32 = arith.constant 0 : index
    %51 = vector.load %arg8[%c0_31, %c0_32] : memref<64x64xbf16, #tpu.memory_space<vmem>>, vector<64x64xbf16>
    %cst_33 = arith.constant dense<0.000000e+00> : vector<2x64xf32>
    %52 = tpu.matmul %50, %51, %cst_33 {dimension_numbers = #tpu.dot_dimension_numbers<[1], [0], [0], [1], [0, 0, 1, 1], [], []>} : vector<2x64xbf16>, vector<64x64xbf16>, vector<2x64xf32> -> vector<2x64xf32>
    %c0_34 = arith.constant 0 : index
    %c0_35 = arith.constant 0 : index
    %53 = vector.load %arg9[%c0_34, %c0_35] : memref<1x64xf32, #tpu.memory_space<vmem>>, vector<1x64xf32>
    %54 = vector.broadcast %53 : vector<1x64xf32> to vector<2x64xf32>
    %55 = arith.addf %52, %54 : vector<2x64xf32>
    %cst_36 = arith.constant 0.000000e+00 : f32
    %56 = vector.broadcast %cst_36 : f32 to vector<2x64xf32>
    %57 = arith.maximumf %55, %56 : vector<2x64xf32>
    %c0_37 = arith.constant 0 : index
    %c0_38 = arith.constant 0 : index
    %58 = vector.load %arg10[%c0_37, %c0_38] : memref<24x64xbf16, #tpu.memory_space<vmem>>, vector<24x64xbf16>
    %59 = arith.truncf %57 : vector<2x64xf32> to vector<2x64xbf16>
    %cst_39 = arith.constant dense<0.000000e+00> : vector<24x2xf32>
    %60 = tpu.matmul %58, %59, %cst_39 {dimension_numbers = #tpu.dot_dimension_numbers<[1], [1], [0], [0], [0, 0, 1, 0], [], []>} : vector<24x64xbf16>, vector<2x64xbf16>, vector<24x2xf32> -> vector<24x2xf32>
    %c0_40 = arith.constant 0 : index
    %c0_41 = arith.constant 0 : index
    %61 = vector.load %arg11[%c0_40, %c0_41] : memref<24x1xf32, #tpu.memory_space<vmem>>, vector<24x1xf32>
    %62 = vector.broadcast %61 : vector<24x1xf32> to vector<24x2xf32>
    %63 = arith.addf %60, %62 : vector<24x2xf32>
    %64 = vector.extract_strided_slice %63 {offsets = [0, 0], sizes = [4, 2], strides = [1, 1]} : vector<24x2xf32> to vector<4x2xf32>
    %65 = vector.extract_strided_slice %63 {offsets = [8, 0], sizes = [1, 2], strides = [1, 1]} : vector<24x2xf32> to vector<1x2xf32>
    %66 = vector.extract_strided_slice %63 {offsets = [16, 0], sizes = [4, 2], strides = [1, 1]} : vector<24x2xf32> to vector<4x2xf32>
    %c0_42 = arith.constant 0 : index
    %c0_43 = arith.constant 0 : index
    %67 = memref.load %arg12[%c0_42, %c0_43] : memref<1x1xf32, #tpu.memory_space<smem>>
    %c0_44 = arith.constant 0 : index
    %c0_45 = arith.constant 0 : index
    %68 = memref.load %arg13[%c0_44, %c0_45] : memref<1x1xf32, #tpu.memory_space<smem>>
    %69 = vector.broadcast %67 : f32 to vector<4x2xf32>
    %70 = arith.subf %69, %66 : vector<4x2xf32>
    %cst_46 = arith.constant 0.000000e+00 : f32
    %71 = vector.broadcast %cst_46 : f32 to vector<4x2xf32>
    %72 = arith.maximumf %70, %71 : vector<4x2xf32>
    %73 = math.absf %70 : vector<4x2xf32>
    %cst_47 = arith.constant 0.000000e+00 : f32
    %74 = vector.broadcast %cst_47 : f32 to vector<4x2xf32>
    %75 = arith.subf %74, %73 : vector<4x2xf32>
    %76 = math.exp %75 : vector<4x2xf32>
    %cst_48 = arith.constant 1.000000e+00 : f32
    %77 = vector.broadcast %cst_48 : f32 to vector<4x2xf32>
    %78 = arith.addf %77, %76 : vector<4x2xf32>
    %79 = math.log %78 : vector<4x2xf32>
    %80 = arith.addf %72, %79 : vector<4x2xf32>
    %81 = vector.broadcast %67 : f32 to vector<4x2xf32>
    %82 = arith.subf %81, %80 : vector<4x2xf32>
    %83 = vector.broadcast %68 : f32 to vector<4x2xf32>
    %84 = arith.subf %82, %83 : vector<4x2xf32>
    %cst_49 = arith.constant 0.000000e+00 : f32
    %85 = vector.broadcast %cst_49 : f32 to vector<4x2xf32>
    %86 = arith.maximumf %84, %85 : vector<4x2xf32>
    %87 = math.absf %84 : vector<4x2xf32>
    %cst_50 = arith.constant 0.000000e+00 : f32
    %88 = vector.broadcast %cst_50 : f32 to vector<4x2xf32>
    %89 = arith.subf %88, %87 : vector<4x2xf32>
    %90 = math.exp %89 : vector<4x2xf32>
    %cst_51 = arith.constant 1.000000e+00 : f32
    %91 = vector.broadcast %cst_51 : f32 to vector<4x2xf32>
    %92 = arith.addf %91, %90 : vector<4x2xf32>
    %93 = math.log %92 : vector<4x2xf32>
    %94 = arith.addf %86, %93 : vector<4x2xf32>
    %95 = vector.broadcast %68 : f32 to vector<4x2xf32>
    %96 = arith.addf %95, %94 : vector<4x2xf32>
    %97 = vector.broadcast %65 : vector<1x2xf32> to vector<4x2xf32>
    %98 = arith.addf %97, %64 : vector<4x2xf32>
    %cst_52 = arith.constant dense<0.000000e+00> : vector<2xf32>
    %99 = vector.multi_reduction <add>, %64, %cst_52 [0] : vector<4x2xf32> to vector<2xf32>
    %100 = vector.shape_cast %99 : vector<2xf32> to vector<1x2xf32>
    %cst_53 = arith.constant 4.000000e+00 : f32
    %101 = vector.broadcast %cst_53 : f32 to vector<1x2xf32>
    %102 = arith.divf %100, %101 : vector<1x2xf32>
    %103 = vector.broadcast %102 : vector<1x2xf32> to vector<4x2xf32>
    %104 = arith.subf %98, %103 : vector<4x2xf32>
    %c0_54 = arith.constant 0 : index
    %c0_55 = arith.constant 0 : index
    %105 = vector.load %arg14[%c0_54, %c0_55] : memref<8x2xf32, #tpu.memory_space<vmem>>, vector<4x2xf32>
    tpu.vector_store %arg14[%c0_54, %c0_55], %104 {strides = array<i32>} : memref<8x2xf32, #tpu.memory_space<vmem>>, vector<4x2xf32>,
    %c4 = arith.constant 4 : index
    %c0_56 = arith.constant 0 : index
    %106 = vector.load %arg14[%c4, %c0_56] : memref<8x2xf32, #tpu.memory_space<vmem>>, vector<4x2xf32>
    tpu.vector_store %arg14[%c4, %c0_56], %96 {strides = array<i32>} : memref<8x2xf32, #tpu.memory_space<vmem>>, vector<4x2xf32>,
    return
  }
  func.func @transform_0(%arg0: i32) -> (i32, i32) {
    %c0_i32 = arith.constant 0 : i32
    %c0_i32_0 = arith.constant 0 : i32
    return %arg0, %c0_i32 : i32, i32
  }
  func.func @transform_1(%arg0: i32) -> (i32, i32, i32) {
    %c0_i32 = arith.constant 0 : i32
    %c0_i32_0 = arith.constant 0 : i32
    %c0_i32_1 = arith.constant 0 : i32
    %c0_i32_2 = arith.constant 0 : i32
    return %c0_i32, %c0_i32_0, %c0_i32_1 : i32, i32, i32
  }
  func.func @transform_2(%arg0: i32) -> (i32, i32) {
    %c0_i32 = arith.constant 0 : i32
    %c0_i32_0 = arith.constant 0 : i32
    %c0_i32_1 = arith.constant 0 : i32
    return %c0_i32, %c0_i32_0 : i32, i32
  }
  func.func @transform_3(%arg0: i32) -> (i32, i32) {
    %c0_i32 = arith.constant 0 : i32
    %c0_i32_0 = arith.constant 0 : i32
    %c0_i32_1 = arith.constant 0 : i32
    return %c0_i32, %c0_i32_0 : i32, i32
  }
  func.func @transform_4(%arg0: i32) -> (i32, i32) {
    %c0_i32 = arith.constant 0 : i32
    %c0_i32_0 = arith.constant 0 : i32
    %c0_i32_1 = arith.constant 0 : i32
    return %c0_i32, %c0_i32_0 : i32, i32
  }
  func.func @transform_5(%arg0: i32) -> (i32, i32) {
    %c0_i32 = arith.constant 0 : i32
    %c0_i32_0 = arith.constant 0 : i32
    %c0_i32_1 = arith.constant 0 : i32
    return %c0_i32, %c0_i32_0 : i32, i32
  }
  func.func @transform_6(%arg0: i32) -> (i32, i32) {
    %c0_i32 = arith.constant 0 : i32
    %c0_i32_0 = arith.constant 0 : i32
    %c0_i32_1 = arith.constant 0 : i32
    return %c0_i32, %c0_i32_0 : i32, i32
  }
  func.func @transform_7(%arg0: i32) -> (i32, i32) {
    %c0_i32 = arith.constant 0 : i32
    %c0_i32_0 = arith.constant 0 : i32
    %c0_i32_1 = arith.constant 0 : i32
    return %c0_i32, %c0_i32_0 : i32, i32
  }
  func.func @transform_8(%arg0: i32) -> (i32, i32) {
    %c0_i32 = arith.constant 0 : i32
    %c0_i32_0 = arith.constant 0 : i32
    %c0_i32_1 = arith.constant 0 : i32
    return %c0_i32, %c0_i32_0 : i32, i32
  }
  func.func @transform_9(%arg0: i32) -> (i32, i32) {
    %c0_i32 = arith.constant 0 : i32
    %c0_i32_0 = arith.constant 0 : i32
    %c0_i32_1 = arith.constant 0 : i32
    return %c0_i32, %c0_i32_0 : i32, i32
  }
  func.func @transform_10(%arg0: i32) -> (i32, i32) {
    %c0_i32 = arith.constant 0 : i32
    %c0_i32_0 = arith.constant 0 : i32
    %c0_i32_1 = arith.constant 0 : i32
    return %c0_i32, %c0_i32_0 : i32, i32
  }
  func.func @transform_11(%arg0: i32) -> (i32, i32) {
    %c0_i32 = arith.constant 0 : i32
    %c0_i32_0 = arith.constant 0 : i32
    %c0_i32_1 = arith.constant 0 : i32
    return %c0_i32, %c0_i32_0 : i32, i32
  }
  func.func @transform_12(%arg0: i32) -> (i32, i32) {
    %c0_i32 = arith.constant 0 : i32
    %c0_i32_0 = arith.constant 0 : i32
    %c0_i32_1 = arith.constant 0 : i32
    return %c0_i32, %c0_i32_0 : i32, i32
  }
  func.func @transform_13(%arg0: i32) -> (i32, i32) {
    %c0_i32 = arith.constant 0 : i32
    %c0_i32_0 = arith.constant 0 : i32
    return %c0_i32, %arg0 : i32, i32
  }
}

</mosaic_0001>

<bundles_post_ra>
// kernel: tpu_custom_call.1
= control target key start
LH: loop header
LB: loop body
LE: loop exit
PB: predicated region body
PF: predicated region fallthrough
CT: control target
= control target key end

     0   :  { %vm191_vm0 = vcmask 1040384   ;;  %vm192_vm1 = vcmask 1041408   ;;  %v1582_v35 = vmov 65535   ;;  %vm187_vm2 = vcmask 154624   ;;  %s2041_s1 = inlined_call_operand.vmem [shape: bf16[4,147,144], index: 1, kind: input, shape index: {}]   ;;  %s2042_s0 = inlined_call_operand.vmem [shape: f32[2,147], index: 0, kind: input, shape index: {}]   ;;  %s2043_s3 = inlined_call_operand.vmem [shape: bf16[144,128], index: 3, kind: input, shape index: {}]   ;;  %s2044_s5 = inlined_call_operand.vmem [shape: bf16[128,64], index: 5, kind: input, shape index: {}]   ;;  %s2045_s2 = inlined_call_operand.vmem [shape: f32[1,144], index: 2, kind: input, shape index: {}]   ;;  %s2046_s7 = inlined_call_operand.vmem [shape: bf16[64,64], index: 7, kind: input, shape index: {}]   ;;  %s2047_s4 = inlined_call_operand.vmem [shape: f32[1,128], index: 4, kind: input, shape index: {}]   ;;  %s2048_s6 = inlined_call_operand.vmem [shape: f32[1,64], index: 6, kind: input, shape index: {}]   ;;  %s2049_s9 = inlined_call_operand.vmem [shape: bf16[24,64], index: 9, kind: input, shape index: {}]   ;;  %s2050_s10 = inlined_call_operand.vmem [shape: f32[24,1], index: 10, kind: input, shape index: {}]   ;;  %s2051_s8 = inlined_call_operand.vmem [shape: f32[1,64], index: 8, kind: input, shape index: {}]   ;;  %s2052_s11 = inlined_call_operand.<no memory space> [shape: f32[1,1], index: 11, kind: input, shape index: {}]   ;;  %s2053_s13 = inlined_call_operand.vmem [shape: f32[8,2], index: 13, kind: output, shape index: {}]   ;;  %s2054_s12 = inlined_call_operand.<no memory space> [shape: f32[1,1], index: 12, kind: input, shape index: {}]  }
   0x1   :  { %v1435_v0 = vld [vmem:[%s2041_s1 + $0x4] ss:$8 sps:$4 sm:$0xff]   ;;  %v1439_v2 = vld [vmem:[%s2041_s1] ss:$8 sps:$4 sm:$0xff]   ;;  %v1441_v4 = vld [vmem:[%s2041_s1 + $0x14] ss:$8 sps:$4 sm:$0xff]  }
   0x2   :  { %v1437_v1 = vld [vmem:[%s2041_s1 + $0x9c] ss:$8 sps:$4 sm:$0xff]   ;;  %201 = vmatprep.subr.bf16.mxu0 %v1435_v0  ;;  %v1440_v3 = vld [vmem:[%s2041_s1 + $0x98] ss:$8 sps:$4 sm:$0xff]   ;;  %v1443_v5 = vld [vmem:[%s2041_s1 + $0xac] ss:$8 sps:$4 sm:$0xff]  }
   0x3   :  { %365 = vmatprep.subr.bf16.mxu1 %v1437_v1  ;;  %202 = vmatpush1.bf16.msra.mxu0 %v1439_v2  ;;  %v1445_v6 = vld [vmem:[%s2041_s1 + $0x10] ss:$8 sps:$4 sm:$0xff]   ;;  %v1447_v8 = vld [vmem:[%s2041_s1 + $0x24] ss:$8 sps:$4 sm:$0xff]   ;;  %v1451_v10 = vld [vmem:[%s2041_s1 + $0x20] ss:$8 sps:$4 sm:$0xff]  }
   0x4   :  { %366 = vmatpush1.bf16.msra.mxu1 %v1440_v3  ;;  %203 = vmatprep.subr.bf16.mxu0 %v1441_v4  ;;  %v1446_v7 = vld [vmem:[%s2041_s1 + $0xa8] ss:$8 sps:$4 sm:$0xff]   ;;  %v1449_v9 = vld [vmem:[%s2041_s1 + $0xbc] ss:$8 sps:$4 sm:$0xff]   ;;  %v1452_v11 = vld [vmem:[%s2041_s1 + $0xb8] ss:$8 sps:$4 sm:$0xff]  }
   0x5   :  { %367 = vmatprep.subr.bf16.mxu1 %v1443_v5  ;;  %v1453_v12 = vld [vmem:[%s2041_s1 + $0x34] ss:$8 sps:$4 sm:$0xff]   ;;  %v1457_v14 = vld [vmem:[%s2041_s1 + $0x30] ss:$8 sps:$4 sm:$0xff]   ;;  %v1459_v16 = vld [vmem:[%s2041_s1 + $0x44] ss:$8 sps:$4 sm:$0xff]  }
   0x6   :  { %v1455_v13 = vld [vmem:[%s2041_s1 + $0xcc] ss:$8 sps:$4 sm:$0xff]   ;;  %v1458_v15 = vld [vmem:[%s2041_s1 + $0xc8] ss:$8 sps:$4 sm:$0xff]   ;;  %v1461_v17 = vld [vmem:[%s2041_s1 + $0xdc] ss:$8 sps:$4 sm:$0xff]  }
   0x7   :  { %204 = vmatpush1.bf16.msra.mxu0 %v1445_v6  ;;  %v1463_v18 = vld [vmem:[%s2041_s1 + $0x40] ss:$8 sps:$4 sm:$0xff]   ;;  %v1465_v20 = vld [vmem:[%s2041_s1 + $0x54] ss:$8 sps:$4 sm:$0xff]   ;;  %v1469_v22 = vld [vmem:[%s2041_s1 + $0x50] ss:$8 sps:$4 sm:$0xff]  }
   0x8   :  { %368 = vmatpush1.bf16.msra.mxu1 %v1446_v7  ;;  %205 = vmatprep.subr.bf16.mxu0 %v1447_v8  ;;  %v1464_v19 = vld [vmem:[%s2041_s1 + $0xd8] ss:$8 sps:$4 sm:$0xff]   ;;  %v1467_v21 = vld [vmem:[%s2041_s1 + $0xec] ss:$8 sps:$4 sm:$0xff]   ;;  %v1470_v23 = vld [vmem:[%s2041_s1 + $0xe8] ss:$8 sps:$4 sm:$0xff]  }
   0x9   :  { %369 = vmatprep.subr.bf16.mxu1 %v1449_v9  ;;  %v1471_v24 = vld [vmem:[%s2041_s1 + $0x64] ss:$8 sps:$4 sm:$0xff]   ;;  %v1475_v26 = vld [vmem:[%s2041_s1 + $0x60] ss:$8 sps:$4 sm:$0xff]   ;;  %v1477_v28 = vld [vmem:[%s2041_s1 + $0x74] ss:$8 sps:$4 sm:$0xff]  }
   0xa   :  { %v1473_v25 = vld [vmem:[%s2041_s1 + $0xfc] ss:$8 sps:$4 sm:$0xff]   ;;  %v1476_v27 = vld [vmem:[%s2041_s1 + $0xf8] ss:$8 sps:$4 sm:$0xff]   ;;  %v1479_v29 = vld [vmem:[%s2041_s1 + $0x10c] ss:$8 sps:$4 sm:$0xff]  }
   0xb   :  { %206 = vmatpush1.bf16.msra.mxu0 %v1451_v10  ;;  %v1201_v30 = vld.sshfl [vmem:[%s2042_s0] sm:$0x33 pattern:$0x76325410]  ;;  %v80_v31 = vld [vmem:[%s2041_s1 + $0x90] sm:$0x33] }
   0xc   :  { %370 = vmatpush1.bf16.msra.mxu1 %v1452_v11  ;;  %207 = vmatprep.subr.bf16.mxu0 %v1453_v12  ;;  %v1241_v32 = vld [vmem:[%s2041_s1 + $0x128] sm:$0x33]  ;;  %v56_v33 = vcombine.high %v1201_v30, %v1201_v30  ;;  %v1481_v34 = vld [vmem:[%s2041_s1 + $0x70] ss:$8 sps:$4 sm:$0xff]   ;;  %v193_v36 = vsel %vm191_vm0, 4294967295, %v1582_v35  ;;  %v1221_v41 = vcombine.high %v80_v31, %v80_v31  ;;  %v1220_v46 = vcombine.low %v80_v31, %v80_v31 }
   0xd   :  { %371 = vmatprep.subr.bf16.mxu1 %v1455_v13  ;;  %v1482_v37 = vld [vmem:[%s2041_s1 + $0x108] ss:$8 sps:$4 sm:$0xff]   ;;  %v1483_v38 = vld [vmem:[%s2041_s1 + $0x84] ss:$8 sps:$4 sm:$0xff]   ;;  %v1261_v42 = vcombine.high %v1241_v32, %v1241_v32  ;;  %v1767_v43 = vsel %vm192_vm1, %v193_v36, 0  ;;  %v1260_v47 = vcombine.low %v1241_v32, %v1241_v32  ;;  %v1787_v54 = vpack.c.bf16 %v1201_v30, %v1201_v30 }
   0xe   :  { %v60_v39 = vpack.c.bf16 %v56_v33, %v56_v33  ;;  %v1485_v40 = vld [vmem:[%s2041_s1 + $0x11c] ss:$8 sps:$4 sm:$0xff]   ;;  %v1487_v44 = vld [vmem:[%s2041_s1 + $0x80] ss:$8 sps:$4 sm:$0xff]   ;;  %v199_v48 = vand.u32 %v1221_v41, %v1767_v43  ;;  %v196_v50 = vand.u32 %v1220_v46, %v1767_v43  ;;  %v1498_v53 = vld [vmem:[%s2041_s1 + $0x1cc] ss:$8 sps:$4 sm:$0xff]  }
   0xf   :  { %208 = vmatpush1.bf16.msra.mxu0 %v1457_v14  ;;  %v1488_v45 = vld [vmem:[%s2041_s1 + $0x118] ss:$8 sps:$4 sm:$0xff]   ;;  %v363_v49 = vand.u32 %v1261_v42, %v1767_v43  ;;  %v360_v51 = vand.u32 %v1260_v47, %v1767_v43  ;;  %v1495_v52 = vld [vmem:[%s2041_s1 + $0x134] ss:$8 sps:$4 sm:$0xff]   ;;  %v1496_v56 = vld [vmem:[%s2041_s1 + $0x1c8] ss:$8 sps:$4 sm:$0xff]  }
  0x10   :  { %372 = vmatpush1.bf16.msra.mxu1 %v1458_v15  ;;  %209 = vmatprep.subr.bf16.mxu0 %v1459_v16  ;;  %v1493_v55 = vld [vmem:[%s2041_s1 + $0x130] ss:$8 sps:$4 sm:$0xff]   ;;  %v1501_v57 = vld [vmem:[%s2041_s1 + $0x144] ss:$8 sps:$4 sm:$0xff]   ;;  %v1499_v59 = vld [vmem:[%s2041_s1 + $0x140] ss:$8 sps:$4 sm:$0xff]  }
  0x11   :  { %373 = vmatprep.subr.bf16.mxu1 %v1461_v17  ;;  %1222 = vmatprep.mubr.msk.bf16.mxu0 %vm187_vm2, %v60_v39  ;;  %v1504_v58 = vld [vmem:[%s2041_s1 + $0x1dc] ss:$8 sps:$4 sm:$0xff]   ;;  %v1502_v60 = vld [vmem:[%s2041_s1 + $0x1d8] ss:$8 sps:$4 sm:$0xff]   ;;  %v1510_v62 = vld [vmem:[%s2041_s1 + $0x1ec] ss:$8 sps:$4 sm:$0xff]  }
  0x12   :  { %1262 = vmatprep.mubr.msk.bf16.mxu1 %vm187_vm2, %v60_v39  ;;  %v1507_v61 = vld [vmem:[%s2041_s1 + $0x154] ss:$8 sps:$4 sm:$0xff]   ;;  %v1505_v63 = vld [vmem:[%s2041_s1 + $0x150] ss:$8 sps:$4 sm:$0xff]   ;;  %v1513_v1 = vld [vmem:[%s2041_s1 + $0x164] ss:$8 sps:$4 sm:$0xff]  }
  0x13   :  { %210 = vmatpush1.bf16.msra.mxu0 %v1463_v18  ;;  %v1508_v0 = vld [vmem:[%s2041_s1 + $0x1e8] ss:$8 sps:$4 sm:$0xff]   ;;  %v1516_v2 = vld [vmem:[%s2041_s1 + $0x1fc] ss:$8 sps:$4 sm:$0xff]   ;;  %v1514_v4 = vld [vmem:[%s2041_s1 + $0x1f8] ss:$8 sps:$4 sm:$0xff]  }
  0x14   :  { %374 = vmatpush1.bf16.msra.mxu1 %v1464_v19  ;;  %211 = vmatprep.subr.bf16.mxu0 %v1465_v20  ;;  %v1511_v3 = vld [vmem:[%s2041_s1 + $0x160] ss:$8 sps:$4 sm:$0xff]   ;;  %v1519_v5 = vld [vmem:[%s2041_s1 + $0x174] ss:$8 sps:$4 sm:$0xff]   ;;  %v1517_v7 = vld [vmem:[%s2041_s1 + $0x170] ss:$8 sps:$4 sm:$0xff]  }
  0x15   :  { %375 = vmatprep.subr.bf16.mxu1 %v1467_v21  ;;  %v1522_v6 = vld [vmem:[%s2041_s1 + $0x20c] ss:$8 sps:$4 sm:$0xff]   ;;  %v1520_v8 = vld [vmem:[%s2041_s1 + $0x208] ss:$8 sps:$4 sm:$0xff]   ;;  %v1528_v10 = vld [vmem:[%s2041_s1 + $0x21c] ss:$8 sps:$4 sm:$0xff]  }
  0x16   :  { %v1525_v9 = vld [vmem:[%s2041_s1 + $0x184] ss:$8 sps:$4 sm:$0xff]   ;;  %v1523_v11 = vld [vmem:[%s2041_s1 + $0x180] ss:$8 sps:$4 sm:$0xff]   ;;  %v1531_v13 = vld [vmem:[%s2041_s1 + $0x194] ss:$8 sps:$4 sm:$0xff]  }
  0x17   :  { %212 = vmatpush1.bf16.msra.mxu0 %v1469_v22  ;;  %v1526_v12 = vld [vmem:[%s2041_s1 + $0x218] ss:$8 sps:$4 sm:$0xff]   ;;  %v1534_v14 = vld [vmem:[%s2041_s1 + $0x22c] ss:$8 sps:$4 sm:$0xff]   ;;  %v1532_v16 = vld [vmem:[%s2041_s1 + $0x228] ss:$8 sps:$4 sm:$0xff]  }
  0x18   :  { %376 = vmatpush1.bf16.msra.mxu1 %v1470_v23  ;;  %213 = vmatprep.subr.bf16.mxu0 %v1471_v24  ;;  %v1529_v15 = vld [vmem:[%s2041_s1 + $0x190] ss:$8 sps:$4 sm:$0xff]   ;;  %v1537_v17 = vld [vmem:[%s2041_s1 + $0x1a4] ss:$8 sps:$4 sm:$0xff]   ;;  %v1535_v21 = vld [vmem:[%s2041_s1 + $0x1a0] ss:$8 sps:$4 sm:$0xff]  }
  0x19   :  { %377 = vmatprep.subr.bf16.mxu1 %v1473_v25  ;;  %v1540_v18 = vld [vmem:[%s2041_s1 + $0x23c] ss:$8 sps:$4 sm:$0xff]   ;;  %v1538_v22 = vld [vmem:[%s2041_s1 + $0x238] ss:$8 sps:$4 sm:$0xff]   ;;  %v1546_v24 = vld [vmem:[%s2041_s1 + $0x24c] ss:$8 sps:$4 sm:$0xff]  }
  0x1a   :  { %v1281_v19 = vld [vmem:[%s2041_s1 + $0x1c0] sm:$0x33]  ;;  %v1321_v20 = vld [vmem:[%s2041_s1 + $0x258] sm:$0x33]  ;;  %v1583_v35 = vmov 0   ;;  %v1556_v41 = vld [vmem:[%s2043_s3 + $0x28] sm:$0xff]  }
  0x1b   :  { %214 = vmatpush1.bf16.msra.mxu0 %v1475_v26  ;;  %v1543_v23 = vld [vmem:[%s2041_s1 + $0x1b4] ss:$8 sps:$4 sm:$0xff]   ;;  %v1301_v25 = vcombine.high %v1281_v19, %v1281_v19  ;;  %v1341_v26 = vcombine.high %v1321_v20, %v1321_v20  ;;  %v1340_v30 = vcombine.low %v1321_v20, %v1321_v20  ;;  %v1551_v36 = vld [vmem:[%s2043_s3] sm:$0xff]   ;;  %1433 = vset.pattern.permute.xlu0 %v1583_v35  ;;  %v1561_v47 = vld [vmem:[%s2044_s5 + $0x8] sm:$0xff]   ;;  %vm823_vm3 = vcmask 130048  }
  0x1c   :  { %378 = vmatpush1.bf16.msra.mxu1 %v1476_v27  ;;  %215 = vmatprep.subr.bf16.mxu0 %v1477_v28  ;;  %v1541_v27 = vld [vmem:[%s2041_s1 + $0x1b0] ss:$8 sps:$4 sm:$0xff]   ;;  %v1560_v46 = vld [vmem:[%s2044_s5] sm:$0xff]   ;;  %vm1585_vm4 = vmmov 0   ;;  %vm1021_vm5 = vcmask 523264   ;;  %vm1184_vm6 = vcmask 11264  }
  0x1d   :  { %379 = vmatprep.subr.bf16.mxu1 %v1479_v29  ;;  %v1544_v28 = vld [vmem:[%s2041_s1 + $0x248] ss:$8 sps:$4 sm:$0xff]   ;;  %v1300_v29 = vcombine.low %v1281_v19, %v1281_v19  ;;  %v529_v31 = vand.u32 %v1301_v25, %v1767_v43  ;;  %v695_v32 = vand.u32 %v1341_v26, %v1767_v43  ;;  %1434 = vset.pattern.permute.xlu1 %v1583_v35 }
  0x1e   :  { %v1557_v42 = vld [vmem:[%s2043_s3 + $0x30] sm:$0xff]  }
  0x1f   :  { %216 = vmatpush1.bf16.msra.mxu0 %v1481_v34  ;;  %v526_v33 = vand.u32 %v1300_v29, %v1767_v43  ;;  %v692_v34 = vand.u32 %v1340_v30, %v1767_v43  ;;  %v1558_v43 = vld [vmem:[%s2043_s3 + $0x38] sm:$0xff]  }
  0x20   :  { %380 = vmatpush1.bf16.msra.mxu1 %v1482_v37  ;;  %217 = vmatprep.subr.bf16.mxu0 %v1483_v38  ;;  %v1552_v37 = vld [vmem:[%s2043_s3 + $0x8] sm:$0xff]   ;;  %v1553_v38 = vld [vmem:[%s2043_s3 + $0x10] sm:$0xff]  }
  0x21   :  { %381 = vmatprep.subr.bf16.mxu1 %v1485_v40  ;;  %v1555_v40 = vld [vmem:[%s2043_s3 + $0x20] sm:$0xff]  }
  0x23   :  { %218 = vmatpush1.bf16.msra.mxu0 %v1487_v44  ;;  %v1559_v44 = vld [vmem:[%s2043_s3 + $0x40] sm:$0xff]  }
  0x24   :  { %382 = vmatpush1.bf16.msra.mxu1 %v1488_v45  ;;  %219 = vmatprep.subr.bf16.mxu0 %v199_v48  ;;  %v1584_v45 = vmov 0.0   ;;  %v1562_v48 = vld [vmem:[%s2044_s5 + $0x10] sm:$0xff]  }
  0x25   :  { %383 = vmatprep.subr.bf16.mxu1 %v363_v49  ;;  %v1563_v49 = vld [vmem:[%s2044_s5 + $0x18] sm:$0xff]  }
  0x27   :  { %220 = vmatpush1.bf16.msra.mxu0 %v196_v50  ;;  %v1564_v50 = vld [vmem:[%s2044_s5 + $0x20] sm:$0xff]  }
  0x28   :  { %384 = vmatpush1.bf16.msra.mxu1 %v360_v51  ;;  %531 = vmatprep.subr.bf16.mxu0 %v1495_v52  ;;  %v1565_v51 = vld [vmem:[%s2044_s5 + $0x28] sm:$0xff]   ;;  %v82_v52 = vlaneseq }
  0x29   :  { %697 = vmatprep.subr.bf16.mxu1 %v1498_v53 }
  0x2a   :  { %234 = vmatmul.mubr.bf16.vlgmr.msra.gmra.mrb[0].mxu0 %v1787_v54  ;;  %v1959_v53 = vshrl.u32 %v82_v52, 7 }
  0x2b   :  { %398 = vmatmul.mubr.bf16.vlgmr.msra.gmra.mrb[0].mxu1 %v1787_v54  ;;  %532 = vmatpush1.bf16.msra.mxu0 %v1493_v55  ;;  %v61_v55 = vld [vmem:[%s2045_s2] sm:$0x3] }
  0x2c   :  { %698 = vmatpush1.bf16.msra.mxu1 %v1496_v56  ;;  %533 = vmatprep.subr.bf16.mxu0 %v1501_v57  ;;  %v88_v56 = vsub.s32 1, %v1959_v53 }
  0x2d   :  { %699 = vmatprep.subr.bf16.mxu1 %v1504_v58  ;;  %1302 = vmatprep.mubr.msk.bf16.mxu0 %vm187_vm2, %v60_v39 }
  0x2e   :  { %1342 = vmatprep.mubr.msk.bf16.mxu1 %vm187_vm2, %v60_v39  ;;  %v1554_v39 = vld [vmem:[%s2043_s3 + $0x18] sm:$0xff]   ;;  %v89_v58 = vrot.slane %v61_v55, %v88_v56 }
  0x2f   :  { %534 = vmatpush1.bf16.msra.mxu0 %v1499_v59 }
  0x30   :  { %700 = vmatpush1.bf16.msra.mxu1 %v1502_v60  ;;  %535 = vmatprep.subr.bf16.mxu0 %v1507_v61 }
  0x31   :  { %701 = vmatprep.subr.bf16.mxu1 %v1510_v62 }
  0x33   :  { %536 = vmatpush1.bf16.msra.mxu0 %v1505_v63 }
  0x34   :  { %702 = vmatpush1.bf16.msra.mxu1 %v1508_v0  ;;  %537 = vmatprep.subr.bf16.mxu0 %v1513_v1 }
  0x35   :  { %703 = vmatprep.subr.bf16.mxu1 %v1516_v2 }
  0x37   :  { %538 = vmatpush1.bf16.msra.mxu0 %v1511_v3 }
  0x38   :  { %704 = vmatpush1.bf16.msra.mxu1 %v1514_v4  ;;  %539 = vmatprep.subr.bf16.mxu0 %v1519_v5 }
  0x39   :  { %705 = vmatprep.subr.bf16.mxu1 %v1522_v6 }
  0x3b   :  { %540 = vmatpush1.bf16.msra.mxu0 %v1517_v7 }
  0x3c   :  { %706 = vmatpush1.bf16.msra.mxu1 %v1520_v8  ;;  %541 = vmatprep.subr.bf16.mxu0 %v1525_v9 }
  0x3d   :  { %707 = vmatprep.subr.bf16.mxu1 %v1528_v10 }
  0x3f   :  { %542 = vmatpush1.bf16.msra.mxu0 %v1523_v11 }
  0x40   :  { %708 = vmatpush1.bf16.msra.mxu1 %v1526_v12  ;;  %543 = vmatprep.subr.bf16.mxu0 %v1531_v13 }
  0x41   :  { %709 = vmatprep.subr.bf16.mxu1 %v1534_v14 }
  0x43   :  { %544 = vmatpush1.bf16.msra.mxu0 %v1529_v15 }
  0x44   :  { %710 = vmatpush1.bf16.msra.mxu1 %v1532_v16  ;;  %545 = vmatprep.subr.bf16.mxu0 %v1537_v17 }
  0x45   :  { %711 = vmatprep.subr.bf16.mxu1 %v1540_v18 }
  0x47   :  { %546 = vmatpush1.bf16.msra.mxu0 %v1535_v21 }
  0x48   :  { %712 = vmatpush1.bf16.msra.mxu1 %v1538_v22  ;;  %547 = vmatprep.subr.bf16.mxu0 %v1543_v23 }
  0x49   :  { %713 = vmatprep.subr.bf16.mxu1 %v1546_v24 }
  0x4b   :  { %548 = vmatpush1.bf16.msra.mxu0 %v1541_v27 }
  0x4c   :  { %714 = vmatpush1.bf16.msra.mxu1 %v1544_v28  ;;  %549 = vmatprep.subr.bf16.mxu0 %v529_v31 }
  0x4d   :  { %715 = vmatprep.subr.bf16.mxu1 %v695_v32 }
  0x4f   :  { %550 = vmatpush1.bf16.msra.mxu0 %v526_v33 }
  0x50   :  { %716 = vmatpush1.bf16.msra.mxu1 %v692_v34  ;;  %827 = vmatprep.subr.bf16.mxu0 %v1583_v35 }
  0x51   :  { %1390 = vmatprep.subr.bf16.mxu1 %v1584_v45 }
  0x52   :  { %564 = vmatmul.mubr.bf16.vlgmr.msra.gmra.mrb[4].mxu0 %v1787_v54 }
  0x53   :  { %730 = vmatmul.mubr.bf16.vlgmr.msra.gmra.mrb[4].mxu1 %v1787_v54  ;;  %828 = vmatpush1.bf16.msra.mxu0 %v1551_v36  ;;  %v84_v54 = vsub.s32 0, %v1959_v53  ;;  %v1567_v36 = vld [vmem:[%s2044_s5 + $0x38] sm:$0xff]  }
  0x54   :  { %829 = vmatprep.subr.bf16.mxu0 %v1583_v35  ;;  %1391 = vmatpush3.bf16.msra.mxu1 %v1560_v46 }
  0x55   :  { %1392 = vmatprep.subr.bf16.mxu1 %v1584_v45  ;;  %v85_v57 = vrot.slane %v61_v55, %v84_v54  ;;  %1406 = vmatprep.mubr.msk.bf16.mxu1 %vm1585_vm4, %v1584_v45 }
  0x57   :  { %830 = vmatpush1.bf16.msra.mxu0 %v1552_v37  ;;  %v1343_v37 = vld [vmem:[%s2047_s4] ss:$0 sm:$0xff] }
  0x58   :  { %831 = vmatprep.subr.bf16.mxu0 %v1583_v35  ;;  %1393 = vmatpush3.bf16.msra.mxu1 %v1561_v47  ;;  %v1569_v47 = vld [vmem:[%s2046_s7 + $0x8] sm:$0xff]  }
  0x59   :  { %1394 = vmatprep.subr.bf16.mxu1 %v1584_v45 }
  0x5b   :  { %832 = vmatpush1.bf16.msra.mxu0 %v1553_v38 }
  0x5c   :  { %833 = vmatprep.subr.bf16.mxu0 %v1583_v35  ;;  %1395 = vmatpush3.bf16.msra.mxu1 %v1562_v48  ;;  %v1570_v48 = vld [vmem:[%s2046_s7 + $0x10] sm:$0xff]  }
  0x5d   :  { %1396 = vmatprep.subr.bf16.mxu1 %v1584_v45 }
  0x5f   :  { %834 = vmatpush1.bf16.msra.mxu0 %v1554_v39 }
  0x60   :  { %835 = vmatprep.subr.bf16.mxu0 %v1583_v35  ;;  %1397 = vmatpush3.bf16.msra.mxu1 %v1563_v49  ;;  %v1571_v49 = vld [vmem:[%s2046_s7 + $0x18] sm:$0xff]  }
  0x61   :  { %1398 = vmatprep.subr.bf16.mxu1 %v1584_v45 }
  0x63   :  { %836 = vmatpush1.bf16.msra.mxu0 %v1555_v40 }
  0x64   :  { %837 = vmatprep.subr.bf16.mxu0 %v1583_v35  ;;  %1399 = vmatpush3.bf16.msra.mxu1 %v1564_v50  ;;  %v1354_v50 = vld [vmem:[%s2048_s6] ss:$0 sm:$0xff] }
  0x65   :  { %1400 = vmatprep.subr.bf16.mxu1 %v1584_v45 }
  0x67   :  { %838 = vmatpush1.bf16.msra.mxu0 %v1556_v41 }
  0x68   :  { %839 = vmatprep.subr.bf16.mxu0 %v1583_v35  ;;  %1401 = vmatpush3.bf16.msra.mxu1 %v1565_v51 }
  0x69   :  { %1402 = vmatprep.subr.bf16.mxu1 %v1584_v45 }
  0x6b   :  { %840 = vmatpush1.bf16.msra.mxu0 %v1557_v42 }
  0x6c   :  { %841 = vmatprep.subr.bf16.mxu0 %v1583_v35 }
  0x6f   :  { %842 = vmatpush1.bf16.msra.mxu0 %v1558_v43 }
  0x70   :  { %843 = vmatprep.subr.bf16.mxu0 %v1583_v35  ;;  %v1566_v35 = vld [vmem:[%s2044_s5 + $0x30] sm:$0xff]  }
  0x71   :  { %1403 = vmatpush3.bf16.msra.mxu1 %v1566_v35 }
  0x72   :  { %1404 = vmatprep.subr.bf16.mxu1 %v1584_v45 }
  0x73   :  { %844 = vmatpush1.bf16.msra.mxu0 %v1559_v44  ;;  %v1568_v44 = vld [vmem:[%s2046_s7] sm:$0xff]  }
  0x75   :  { %1405 = vmatpush3.bf16.msra.mxu1 %v1567_v36 }
  0x76   :  { %1410 = vmatprep.subr.bf16.mxu1 %v1584_v45 }
  0xfd   :  { %v235_v59 = vpop.f32.mrb[0].mxu0 }
  0xfe   :  { %v399_v60 = vpop.f32.mrb[0].mxu1  ;;  %v236_v61 = vadd.f32 %v235_v59, %v85_v57  ;;  %v237_v63 = vpop.f32.mrb[1].mxu0 }
  0xff   :  { %v400_v62 = vadd.f32 %v399_v60, %v85_v57  ;;  %v401_v0 = vpop.f32.mrb[1].mxu1  ;;  %v238_v1 = vadd.f32 %v237_v63, %v89_v58  ;;  %v239_v3 = vpop.f32.mrb[2].mxu0  ;;  %v1072_v60 = vld [vmem:[%s2050_s10 + $0x10] sm:$0xff]  ;;  %v1363_v63 = vld [vmem:[%s2051_s8] ss:$0 sm:$0xff] }
 0x100   :  { %v402_v2 = vadd.f32 %v401_v0, %v89_v58  ;;  %v403_v4 = vpop.f32.mrb[2].mxu1  ;;  %v242_v5 = vmax.f32 %v236_v61, 0.0  ;;  %v240_v7 = vpop.f32.mrb[3].mxu0  ;;  %v1071_v61 = vld [vmem:[%s2050_s10 + $0x8] sm:$0xff]  ;;  %1085 = vperm.xlu0 %1433, %v1072_v60  }
 0x101   :  { %v406_v6 = vmax.f32 %v400_v62, 0.0  ;;  %v404_v8 = vpop.f32.mrb[3].mxu1  ;;  %v243_v9 = vmax.f32 %v238_v1, 0.0  ;;  %1080 = vperm.xlu1 %1434, %v1071_v61   ;;  %v1070_v62 = vld [vmem:[%s2050_s10] sm:$0xff] }
 0x102   :  { %v407_v10 = vmax.f32 %v402_v2, 0.0  ;;  %v1573_v8 = vld [vmem:[%s2049_s9 + $0x8] ss:$0 sps:$4 sm:$0xff]  }
 0x103   :  { %v408_v11 = vmax.f32 %v242_v5, %v406_v6 }
 0x104   :  { %v409_v12 = vmax.f32 %v243_v9, %v407_v10  ;;  %1075 = vperm.xlu0 %1433, %v1070_v62  }
 0x125   :  { %v565_v13 = vpop.f32.mrb[4].mxu0 }
 0x126   :  { %v731_v14 = vpop.f32.mrb[4].mxu1  ;;  %v566_v15 = vadd.f32 %v565_v13, %v85_v57  ;;  %v567_v17 = vpop.f32.mrb[5].mxu0 }
 0x127   :  { %v732_v16 = vadd.f32 %v731_v14, %v85_v57  ;;  %v733_v18 = vpop.f32.mrb[5].mxu1  ;;  %v568_v19 = vadd.f32 %v567_v17, %v89_v58  ;;  %v569_v21 = vpop.f32.mrb[6].mxu0 }
 0x128   :  { %v734_v20 = vadd.f32 %v733_v18, %v89_v58  ;;  %v735_v22 = vpop.f32.mrb[6].mxu1  ;;  %v572_v23 = vmax.f32 %v566_v15, 0.0  ;;  %v570_v25 = vpop.f32.mrb[7].mxu0 }
 0x129   :  { %v738_v24 = vmax.f32 %v732_v16, 0.0  ;;  %v736_v26 = vpop.f32.mrb[7].mxu1  ;;  %v573_v27 = vmax.f32 %v568_v19, 0.0 }
 0x12a   :  { %v739_v28 = vmax.f32 %v734_v20, 0.0  ;;  %v574_v29 = vmax.f32 %v408_v11, %v572_v23 }
 0x12b   :  { %v575_v30 = vmax.f32 %v409_v12, %v573_v27  ;;  %v1155_v12 = vstv %s2052_s11 }
 0x12c   :  { %v740_v31 = vmax.f32 %v574_v29, %v738_v24 }
 0x12d   :  { %v741_v32 = vmax.f32 %v575_v30, %v739_v28 }
 0x12e   :  { %v742_v34 = vpack.c.bf16 %v740_v31, %v740_v31 }
 0x12f   :  { %v743_v33 = vpack.c.bf16 %v741_v32, %v741_v32 }
 0x131   :  { %1353 = vmatprep.mubr.msk.bf16.mxu0 %vm823_vm3, %v743_v33 }
 0x132   :  { %860 = vmatmul.mubr.bf16.vlgmr.msra.gmra.mrb[8].mxu0 %v742_v34 }
 0x17f   :  { %v1086_v9 = vpop.permute.xlu0 %1085 }
 0x180   :  { %v1081_v15 = vpop.permute.xlu1 %1080 }
 0x183   :  { %v1076_v10 = vpop.permute.xlu0 %1075 }
 0x205   :  { %v861_v38 = vpop.f32.mrb[8].mxu0 }
 0x206   :  { %v862_v39 = vadd.f32 %v1343_v37, %v861_v38  ;;  %v863_v40 = vpop.f32.mrb[9].mxu0 }
 0x207   :  { %v864_v41 = vpop.f32.mrb[10].mxu0 }
 0x208   :  { %v867_v42 = vmax.f32 %v862_v39, 0.0  ;;  %v865_v43 = vpop.f32.mrb[11].mxu0  ;;  %v1167_v39 = vstv %s2054_s12 }
 0x20a   :  { %v868_v46 = vpack.c.bf16 %v867_v42, %v867_v42 }
 0x20c   :  { %1407 = vmatmul.mubr.bf16.vlgmr.msra.gmra.mrb[8].mxu1 %v868_v46 }
 0x20d   :  { %1411 = vmatpush3.bf16.msra.mxu1 %v1568_v44  ;;  %1418 = vmatprep.mubr.msk.bf16.mxu1 %vm1585_vm4, %v1584_v45 }
 0x20e   :  { %1412 = vmatprep.subr.bf16.mxu1 %v1584_v45 }
 0x211   :  { %1413 = vmatpush3.bf16.msra.mxu1 %v1569_v47 }
 0x212   :  { %1414 = vmatprep.subr.bf16.mxu1 %v1584_v45 }
 0x215   :  { %1415 = vmatpush3.bf16.msra.mxu1 %v1570_v48 }
 0x216   :  { %1416 = vmatprep.subr.bf16.mxu1 %v1584_v45  ;;  %v1572_v45 = vld [vmem:[%s2049_s9] sm:$0xff]  }
 0x217   :  { %1424 = vmatprep.mubr.msk.bf16.mxu0 %vm1021_vm5, %v1572_v45 }
 0x219   :  { %1417 = vmatpush3.bf16.msra.mxu1 %v1571_v49 }
 0x2df   :  { %v974_v51 = vpop.f32.mrb[8].mxu1 }
 0x2e0   :  { %v975_v52 = vadd.f32 %v1354_v50, %v974_v51  ;;  %v1408_v55 = vpop.f32.mrb[9].mxu1 }
 0x2e1   :  { %v977_v56 = vpop.f32.mrb[10].mxu1 }
 0x2e2   :  { %v980_v57 = vmax.f32 %v975_v52, 0.0  ;;  %v1409_v58 = vpop.f32.mrb[11].mxu1 }
 0x2e4   :  { %v981_v59 = vpack.c.bf16 %v980_v57, %v980_v57 }
 0x2e6   :  { %1419 = vmatmul.mubr.msk.bf16.vlgmr.msra.gmra.mrb[12].mxu1 %vm1021_vm5, %v981_v59 }
 0x3b9   :  { %v1059_v0 = vpop.f32.mrb[12].mxu1 }
 0x3ba   :  { %v1060_v1 = vadd.f32 %v1363_v63, %v1059_v0  ;;  %v1420_v2 = vpop.f32.mrb[13].mxu1 }
 0x3bb   :  { %v1062_v3 = vpop.f32.mrb[14].mxu1 }
 0x3bc   :  { %v1065_v4 = vmax.f32 %v1060_v1, 0.0  ;;  %v1421_v5 = vpop.f32.mrb[15].mxu1 }
 0x3be   :  { %v1069_v6 = vpack.c.bf16 %v1065_v4, %v1065_v4 }
 0x3c0   :  { %1428 = vmatprep.subr.msk.bf16.mxu0 %vm1021_vm5, %v1069_v6  ;;  %v1103_v7 = vsel %vm1021_vm5, %v1069_v6, 0 }
 0x3c1   :  { %1423 = vmatpush3.bf16.xpose.msra.mxu0 %v1103_v7 }
 0x3c8   :  { %1425 = vmatmul.mubr.msk.bf16.vlgmr.msra.gmra.mrb[12].mxu0 %vm1021_vm5, %v1573_v8 }
 0x49b   :  { %v1426_v11 = vpop.f32.mrb[12].mxu0 }
 0x49c   :  { %v1148_v13 = vadd.f32 %v1426_v11, %v1086_v9  ;;  %v1139_v14 = vpop.f32.mrb[13].mxu0 }
 0x49d   :  { %v1140_v16 = vadd.f32 %v1139_v14, %v1076_v10  ;;  %v1427_v17 = vpop.f32.mrb[14].mxu0 }
 0x49e   :  { %v1156_v18 = vsub.f32 %v1155_v12, %v1148_v13  ;;  %v1142_v19 = vpop.f32.mrb[15].mxu0 }
 0x49f   :  { %v1185_v20 = vsel %vm1184_vm6, %v1140_v16, 0.0  ;;  %v1143_v21 = vadd.f32 %v1142_v19, %v1081_v15 }
 0x4a0   :  { %v1158_v22 = vand.u32 2147483647, %v1156_v18  ;;  %v1186_v23 = vrot.slane %v1185_v20, 4 }
 0x4a1   :  { %v1182_v24 = vrot.slane %v1143_v21, %v84_v54  ;;  %v1157_v54 = vmax.f32 %v1156_v18, 0.0 }
 0x4a2   :  { %v1159_v25 = vsub.f32 0.0, %v1158_v22  ;;  %v1187_v26 = vadd.f32 %v1186_v23, %v1185_v20 }
 0x4a3   :  { %v1183_v27 = vadd.f32 %v1182_v24, %v1140_v16 }
 0x4a4   :  { %v1160_v28 = vmul.f32 1.442695, %v1159_v25  ;;  %v1188_v29 = vrot.slane %v1187_v26, 2 }
 0x4a6   :  { %1574 = vpow2.f32 %v1160_v28  ;;  %v1189_v30 = vadd.f32 %v1188_v29, %v1187_v26 }
 0x4a8   :  { %v1190_v31 = vrot.slane %v1189_v30, 1 }
 0x4aa   :  { %v1191_v32 = vadd.f32 %v1190_v31, %v1189_v30 }
 0x4ac   :  { %v1193_v33 = vmul.f32 0.25, %v1191_v32 }
 0x4ae   :  { %v1194_v34 = vsub.f32 %v1183_v27, %v1193_v33 }
 0x4b0   :  { %v1575_v35 = vpop.eup %1574  ;;  %1195 = vst.msk [vmem:[%s2053_s13] sm:$0xf] %vm1184_vm6, %v1194_v34 }
 0x4b1   :  { %v1162_v36 = vadd.f32 1.0, %v1575_v35 }
 0x4b3   :  { %1576 = vlog2.f32 %v1162_v36 }
 0x4bd   :  { %v1577_v53 = vpop.eup %1576 }
 0x4be   :  { %v1164_v37 = vmul.f32 0.6931472, %v1577_v53 }
 0x4c0   :  { %v1165_v38 = vadd.f32 %v1164_v37, %v1157_v54 }
 0x4c2   :  { %v1166_v40 = vsub.f32 %v1155_v12, %v1165_v38 }
 0x4c4   :  { %v1168_v41 = vsub.f32 %v1166_v40, %v1167_v39 }
 0x4c6   :  { %v1170_v42 = vand.u32 2147483647, %v1168_v41  ;;  %v1169_v49 = vmax.f32 %v1168_v41, 0.0 }
 0x4c8   :  { %v1171_v43 = vsub.f32 0.0, %v1170_v42 }
 0x4ca   :  { %v1172_v44 = vmul.f32 1.442695, %v1171_v43 }
 0x4cc   :  { %1578 = vpow2.f32 %v1172_v44 }
 0x4d6   :  { %v1579_v46 = vpop.eup %1578 }
 0x4d7   :  { %v1174_v47 = vadd.f32 1.0, %v1579_v46 }
 0x4d9   :  { %1580 = vlog2.f32 %v1174_v47 }
 0x4e3   :  { %v1581_v48 = vpop.eup %1580 }
 0x4e4   :  { %v1176_v50 = vmul.f32 0.6931472, %v1581_v48 }
 0x4e6   :  { %v1177_v51 = vadd.f32 %v1176_v50, %v1169_v49 }
 0x4e8   :  { %v1178_v52 = vadd.f32 %v1177_v51, %v1167_v39 }
 0x4ea   :  { %1196 = vst.msk [vmem:[%s2053_s13 + $0x4] sm:$0xf] %vm1184_vm6, %v1178_v52 }

</bundles_post_ra>
